<compile_context>
chip_gen: v7x
topology: tpu7x:2x2x1
jax: 0.10.0
libtpu: 0.0.40
codegen_flags: <defaults>
</compile_context>

<pallas_src>
import functools

import jax
import jax.numpy as jnp
from jax.experimental import pallas as pl
from jax.experimental.pallas import tpu as pltpu

_MASK = -1e30  # large finite negative: exp underflows to 0, never produces NaN


def _gat_layer_kernel(hsrc_ref, hdst_ref, wsq_ref, qd_ref, bias_ref, adjb_ref, out_ref,
                      *, num_heads, head_dim, negative_slope, mode, fin):
    """Fused all-heads GATConv over one dst-node tile.

    hsrc_ref : [N_src, Fin]        source node features (full graph)
    hdst_ref : [T, Fin]            dst node features for this tile
    wsq_ref  : [Fin, H*D + H]      [ W_src stacked over heads | W_src @ attn_l ]
    qd_ref   : [Fin, H]            W_dst @ attn_r  (feat_dst only feeds er; residual off)
    bias_ref : [1, H*D]            per-head bias, head-major
    adjb_ref : [T, N_src]          additive adjacency bias (0 if edge u->v else -1e30), bf16
    out_ref  : [T, H*D] (mode=="elu")  or  [T, D] (mode=="mean")
    """
    H, D = num_heads, head_dim
    HD = H * D

    hs = hsrc_ref[...]                                   # [N_src, Fin] f32
    hd = hdst_ref[...]                                   # [T, Fin]     f32

    if fin == 1:
        # K=1 matmul would leave the MXU idle -> VPU broadcast multiply instead.
        proj_src = hs * wsq_ref[...]                     # [N_src, HD+H]
        er = hd * qd_ref[...]                            # [T, H]
    else:
        hs16 = hs.astype(jnp.bfloat16)
        proj_src = jnp.dot(hs16, wsq_ref[...].astype(jnp.bfloat16),
                           preferred_element_type=jnp.float32)          # [N_src, HD+H]
        er = jnp.dot(hd.astype(jnp.bfloat16), qd_ref[...].astype(jnp.bfloat16),
                     preferred_element_type=jnp.float32)                # [T, H]

    feat_src16 = proj_src[:, :HD].astype(jnp.bfloat16)   # [N_src, HD]  (bf16 for MXU agg)
    el_t = proj_src[:, HD:].T                            # [H, N_src]   (one transpose, not H)

    adjb = adjb_ref[...].astype(jnp.float32)             # [T, N_src] additive mask

    outs = []
    acc = None
    for h in range(H):
        # e[v, u] = leaky_relu(el[u] + er[v]) + mask  (leaky_relu BEFORE the mask, as in DGL)
        e = er[:, h:h + 1] + el_t[h:h + 1, :]            # [T, N_src]
        e = jnp.maximum(e, negative_slope * e)           # leaky_relu (slope < 1)
        e = e + adjb
        m = jnp.max(e, axis=1, keepdims=True)            # finite: every row has >=1 edge
        p = jnp.exp(e - m)                               # masked entries underflow to 0
        denom = jnp.sum(p, axis=1, keepdims=True)
        alpha = p * pl.reciprocal(denom, approx=True)    # EUP reciprocal, no divide

        rst = jnp.dot(alpha.astype(jnp.bfloat16), feat_src16[:, h * D:(h + 1) * D],
                      preferred_element_type=jnp.float32)                # [T, D]
        rst = rst + bias_ref[:, h * D:(h + 1) * D]

        if mode == "mean":                               # last layer: mean over heads
            acc = rst if acc is None else acc + rst
        else:                                            # hidden layer: fused ELU
            outs.append(jnp.where(rst > 0, rst, jnp.exp(rst) - 1.0))

    if mode == "mean":
        out_ref[...] = acc * (1.0 / H)
    else:
        out_ref[...] = jnp.concatenate(outs, axis=-1) if H > 1 else outs[0]


def gat_conv(h_src, h_dst, packed, adj_bias, *, negative_slope=0.2, mode="elu",
             max_tile_dst=256):
    """One fused GATConv layer (all heads), dst-node tiled. Returns [N_dst, H*D] or [N_dst, D]."""
    wsq, qd, bias = packed
    Fin = wsq.shape[0]
    H = qd.shape[1]
    HD = wsq.shape[1] - H
    D = HD // H
    N_src = h_src.shape[0]
    N_dst = h_dst.shape[0]

    # dst-node tiling: sized well under the v7x 64 MiB VMEM budget, "parallel" across TCs.
    tile = N_dst if N_dst <= max_tile_dst else max_tile_dst
    pad = (-N_dst) % tile
    if pad:
        h_dst = jnp.pad(h_dst, ((0, pad), (0, 0)))
        adj_bias = jnp.pad(adj_bias, ((0, pad), (0, 0)), constant_values=_MASK)
    N_dst_p = N_dst + pad
    grid = (N_dst_p // tile,)

    out_cols = HD if mode == "elu" else D

    kernel = functools.partial(_gat_layer_kernel, num_heads=H, head_dim=D,
                               negative_slope=negative_slope, mode=mode, fin=Fin)

    cost = pl.CostEstimate(
        flops=2 * grid[0] * (N_src * Fin * (HD + H) + tile * Fin * H + tile * N_src * HD),
        transcendentals=grid[0] * tile * N_src * H,
        bytes_accessed=4 * (grid[0] * N_src * Fin + N_dst_p * Fin + N_dst_p * out_cols)
                       + 2 * N_dst_p * N_src,
    )

    out = pl.pallas_call(
        kernel,
        out_shape=jax.ShapeDtypeStruct((N_dst_p, out_cols), jnp.float32),
        grid=grid,
        in_specs=[
            pl.BlockSpec((N_src, Fin), lambda i: (0, 0)),       # h_src (full, reused per tile)
            pl.BlockSpec((tile, Fin), lambda i: (i, 0)),        # h_dst tile
            pl.BlockSpec((Fin, HD + H), lambda i: (0, 0)),      # [W_src | W_src@a_l] stacked
            pl.BlockSpec((Fin, H), lambda i: (0, 0)),           # W_dst@a_r stacked
            pl.BlockSpec((1, HD), lambda i: (0, 0)),            # bias
            pl.BlockSpec((tile, N_src), lambda i: (i, 0)),      # bf16 additive adjacency bias
        ],
        out_specs=pl.BlockSpec((tile, out_cols), lambda i: (i, 0)),
        compiler_params=pltpu.CompilerParams(
            dimension_semantics=("parallel",),                  # node tiles split across TCs (v7x)
            vmem_limit_bytes=64 * 1024 * 1024,
        ),
        cost_estimate=cost,
    )(h_src, h_dst, wsq, qd, bias, adj_bias)

    return out[:N_dst]


def gat_forward(adj, packed_params, negative_slope=0.2):
    """Reproduces GAT.forward on a full graph (src == dst nodes)."""
    # h = block.in_degrees().view(-1, 1).float();  adj[v, u] = 1 iff edge u -> v
    h = jnp.sum(adj, axis=1, keepdims=True).astype(jnp.float32)          # [N, 1]
    # Additive softmax mask, bf16 to halve the O(N^2) DMA.
    adj_bias = jnp.where(adj > 0, 0.0, _MASK).astype(jnp.bfloat16)       # [N, N]

    n_layers = len(packed_params)
    for l, packed in enumerate(packed_params):
        mode = "elu" if l != n_layers - 1 else "mean"
        h = gat_conv(h, h, packed, adj_bias, negative_slope=negative_slope, mode=mode)
    hg = h.mean(axis=0, keepdims=True)                                   # dgl.mean_nodes -> [1, C]
    return hg


def pack_layer_params(w_src, w_dst, attn_l, attn_r, bias):
    """Fold per-head GATConv params into lane-dense stacked matrices (host side).

    w_src, w_dst: [H, Fin, D]; attn_l, attn_r, bias: [H, 1, D].
    Returns (wsq [Fin, H*D+H], qd [Fin, H], bias [1, H*D]).
    """
    H, Fin, D = w_src.shape
    ws = jnp.transpose(w_src, (1, 0, 2)).reshape(Fin, H * D)             # heads stacked on lanes
    qs = jnp.einsum('hfd,hd->fh', w_src, attn_l[:, 0, :])                # attn_l folded into W_src
    qd = jnp.einsum('hfd,hd->fh', w_dst, attn_r[:, 0, :])                # attn_r folded into W_dst
    wsq = jnp.concatenate([ws, qs], axis=1)                              # [Fin, H*D + H]
    b = bias[:, 0, :].reshape(1, H * D)
    return (wsq.astype(jnp.float32), qd.astype(jnp.float32), b.astype(jnp.float32))


def init_gat_params(key, in_dim, num_hidden, num_classes, heads):
    """Deterministic parameter init matching the GAT __init__ shapes (num_layers=1)."""
    layer_dims = [
        (in_dim, num_hidden, heads[0]),                    # GATConv((in_dim,in_dim) -> hidden)
        (num_hidden * heads[-2], num_classes, heads[-1]),  # GATConv(hidden*heads[-2] -> classes)
    ]
    params = []
    for fin, dout, h in layer_dims:
        key, k1, k2, k3, k4 = jax.random.split(key, 5)
        scale = 1.0 / jnp.sqrt(jnp.float32(fin))
        w_src = jax.random.normal(k1, (h, fin, dout), jnp.float32) * scale
        w_dst = jax.random.normal(k2, (h, fin, dout), jnp.float32) * scale
        attn_l = jax.random.normal(k3, (h, 1, dout), jnp.float32) * 0.1
        attn_r = jax.random.normal(k4, (h, 1, dout), jnp.float32) * 0.1
        bias = jnp.zeros((h, 1, dout), jnp.float32)
        params.append((w_src, w_dst, attn_l, attn_r, bias))
    return params


if __name__ == "__main__":
    key = jax.random.PRNGKey(0)
    N = 16            # nodes
    in_dim = 1        # in_degrees().view(-1, 1) -> feature dim is 1
    num_hidden = 8
    num_classes = 4
    heads = (4, 2)
    negative_slope = 0.2

    k_adj, k_par = jax.random.split(key)
    adj = (jax.random.uniform(k_adj, (N, N)) < 0.3).astype(jnp.float32)
    # self-loops: every node has >= 1 in-edge (DGL GATConv requires no zero-in-degree nodes)
    adj = adj.at[jnp.arange(N), jnp.arange(N)].set(1.0)

    raw_params = init_gat_params(k_par, in_dim, num_hidden, num_classes, heads)
    packed_params = [pack_layer_params(*p) for p in raw_params]

    hg = gat_forward(adj, packed_params, negative_slope=negative_slope)
    hg = jax.block_until_ready(hg)

    assert hg.shape == (1, num_classes), hg.shape
    assert bool(jnp.all(jnp.isfinite(hg)))
    print("KERNEL_OK")
</pallas_src>

<mosaic_0001>
module attributes {stable_mosaic.version = 11 : i64} {
  func.func @_gat_layer_kernel(%arg0: i32, %arg1: memref<16x1xf32, #tpu.memory_space<vmem>>, %arg2: memref<16x1xf32, #tpu.memory_space<vmem>>, %arg3: memref<1x36xf32, #tpu.memory_space<vmem>>, %arg4: memref<1x4xf32, #tpu.memory_space<vmem>>, %arg5: memref<1x32xf32, #tpu.memory_space<vmem>>, %arg6: memref<16x16xbf16, #tpu.memory_space<vmem>>, %arg7: memref<16x32xf32, #tpu.memory_space<vmem>>) attributes {dimension_semantics = [#tpu.dimension_semantics<parallel>], iteration_bounds = array<i64: 1>, scalar_prefetch = 0 : i64, scratch_operands = 0 : i64, tpu.core_type = #tpu.core_type<tc>, window_params = [{pipeline_mode = #tpu.pipeline_mode<synchronous>, transform_indices = @transform_0, window_bounds = array<i64: 16, 1>}, {transform_indices = @transform_1, window_bounds = array<i64: 16, 1>}, {pipeline_mode = #tpu.pipeline_mode<synchronous>, transform_indices = @transform_2, window_bounds = array<i64: 1, 36>}, {pipeline_mode = #tpu.pipeline_mode<synchronous>, transform_indices = @transform_3, window_bounds = array<i64: 1, 4>}, {pipeline_mode = #tpu.pipeline_mode<synchronous>, transform_indices = @transform_4, window_bounds = array<i64: 1, 32>}, {transform_indices = @transform_5, window_bounds = array<i64: 16, 16>}, {transform_indices = @transform_6, window_bounds = array<i64: 16, 32>}]} {
    %c0 = arith.constant 0 : index
    %c0_0 = arith.constant 0 : index
    %0 = vector.load %arg1[%c0, %c0_0] : memref<16x1xf32, #tpu.memory_space<vmem>>, vector<16x1xf32>
    %c0_1 = arith.constant 0 : index
    %c0_2 = arith.constant 0 : index
    %1 = vector.load %arg2[%c0_1, %c0_2] : memref<16x1xf32, #tpu.memory_space<vmem>>, vector<16x1xf32>
    %c0_3 = arith.constant 0 : index
    %c0_4 = arith.constant 0 : index
    %2 = vector.load %arg3[%c0_3, %c0_4] : memref<1x36xf32, #tpu.memory_space<vmem>>, vector<1x36xf32>
    %3 = vector.broadcast %0 : vector<16x1xf32> to vector<16x36xf32>
    %4 = vector.broadcast %2 : vector<1x36xf32> to vector<16x36xf32>
    %5 = arith.mulf %3, %4 : vector<16x36xf32>
    %c0_5 = arith.constant 0 : index
    %c0_6 = arith.constant 0 : index
    %6 = vector.load %arg4[%c0_5, %c0_6] : memref<1x4xf32, #tpu.memory_space<vmem>>, vector<1x4xf32>
    %7 = vector.broadcast %1 : vector<16x1xf32> to vector<16x4xf32>
    %8 = vector.broadcast %6 : vector<1x4xf32> to vector<16x4xf32>
    %9 = arith.mulf %7, %8 : vector<16x4xf32>
    %10 = vector.extract_strided_slice %5 {offsets = [0, 0], sizes = [16, 32], strides = [1, 1]} : vector<16x36xf32> to vector<16x32xf32>
    %11 = arith.truncf %10 : vector<16x32xf32> to vector<16x32xbf16>
    %12 = vector.extract_strided_slice %5 {offsets = [0, 32], sizes = [16, 4], strides = [1, 1]} : vector<16x36xf32> to vector<16x4xf32>
    %13 = tpu.transpose %12, [1, 0] : vector<16x4xf32> -> vector<4x16xf32>
    %c0_7 = arith.constant 0 : index
    %c0_8 = arith.constant 0 : index
    %14 = vector.load %arg6[%c0_7, %c0_8] : memref<16x16xbf16, #tpu.memory_space<vmem>>, vector<16x16xbf16>
    %15 = arith.extf %14 : vector<16x16xbf16> to vector<16x16xf32>
    %16 = vector.extract_strided_slice %9 {offsets = [0, 0], sizes = [16, 1], strides = [1, 1]} : vector<16x4xf32> to vector<16x1xf32>
    %17 = vector.extract_strided_slice %13 {offsets = [0, 0], sizes = [1, 16], strides = [1, 1]} : vector<4x16xf32> to vector<1x16xf32>
    %18 = vector.broadcast %16 : vector<16x1xf32> to vector<16x16xf32>
    %19 = vector.broadcast %17 : vector<1x16xf32> to vector<16x16xf32>
    %20 = arith.addf %18, %19 : vector<16x16xf32>
    %cst = arith.constant 2.000000e-01 : f32
    %21 = vector.broadcast %cst : f32 to vector<16x16xf32>
    %22 = arith.mulf %21, %20 : vector<16x16xf32>
    %23 = arith.maximumf %20, %22 : vector<16x16xf32>
    %24 = arith.addf %23, %15 : vector<16x16xf32>
    %cst_9 = arith.constant dense<0xFF800000> : vector<16xf32>
    %25 = vector.multi_reduction <maximumf>, %24, %cst_9 [1] : vector<16x16xf32> to vector<16xf32>
    %26 = vector.shape_cast %25 : vector<16xf32> to vector<16x1xf32>
    %27 = vector.broadcast %26 : vector<16x1xf32> to vector<16x16xf32>
    %28 = arith.subf %24, %27 : vector<16x16xf32>
    %29 = math.exp %28 : vector<16x16xf32>
    %cst_10 = arith.constant dense<0.000000e+00> : vector<16xf32>
    %30 = vector.multi_reduction <add>, %29, %cst_10 [1] : vector<16x16xf32> to vector<16xf32>
    %31 = vector.shape_cast %30 : vector<16xf32> to vector<16x1xf32>
    %32 = tpu.reciprocal %31 {approx = true} : vector<16x1xf32> -> vector<16x1xf32>
    %33 = vector.broadcast %32 : vector<16x1xf32> to vector<16x16xf32>
    %34 = arith.mulf %29, %33 : vector<16x16xf32>
    %35 = arith.truncf %34 : vector<16x16xf32> to vector<16x16xbf16>
    %36 = vector.extract_strided_slice %11 {offsets = [0, 0], sizes = [16, 8], strides = [1, 1]} : vector<16x32xbf16> to vector<16x8xbf16>
    %cst_11 = arith.constant dense<0.000000e+00> : vector<16x8xf32>
    %37 = tpu.matmul %35, %36, %cst_11 {dimension_numbers = #tpu.dot_dimension_numbers<[1], [0], [0], [1], [0, 0, 1, 1], [], []>} : vector<16x16xbf16>, vector<16x8xbf16>, vector<16x8xf32> -> vector<16x8xf32>
    %c0_12 = arith.constant 0 : index
    %c0_13 = arith.constant 0 : index
    %38 = vector.load %arg5[%c0_12, %c0_13] : memref<1x32xf32, #tpu.memory_space<vmem>>, vector<1x8xf32>
    %39 = vector.broadcast %38 : vector<1x8xf32> to vector<16x8xf32>
    %40 = arith.addf %37, %39 : vector<16x8xf32>
    %cst_14 = arith.constant 0.000000e+00 : f32
    %41 = vector.broadcast %cst_14 : f32 to vector<16x8xf32>
    %42 = arith.cmpf ogt, %40, %41 : vector<16x8xf32>
    %43 = math.exp %40 : vector<16x8xf32>
    %cst_15 = arith.constant 1.000000e+00 : f32
    %44 = vector.broadcast %cst_15 : f32 to vector<16x8xf32>
    %45 = arith.subf %43, %44 : vector<16x8xf32>
    %46 = arith.select %42, %40, %45 : vector<16x8xi1>, vector<16x8xf32>
    %47 = vector.extract_strided_slice %9 {offsets = [0, 1], sizes = [16, 1], strides = [1, 1]} : vector<16x4xf32> to vector<16x1xf32>
    %48 = vector.extract_strided_slice %13 {offsets = [1, 0], sizes = [1, 16], strides = [1, 1]} : vector<4x16xf32> to vector<1x16xf32>
    %49 = vector.broadcast %47 : vector<16x1xf32> to vector<16x16xf32>
    %50 = vector.broadcast %48 : vector<1x16xf32> to vector<16x16xf32>
    %51 = arith.addf %49, %50 : vector<16x16xf32>
    %cst_16 = arith.constant 2.000000e-01 : f32
    %52 = vector.broadcast %cst_16 : f32 to vector<16x16xf32>
    %53 = arith.mulf %52, %51 : vector<16x16xf32>
    %54 = arith.maximumf %51, %53 : vector<16x16xf32>
    %55 = arith.addf %54, %15 : vector<16x16xf32>
    %cst_17 = arith.constant dense<0xFF800000> : vector<16xf32>
    %56 = vector.multi_reduction <maximumf>, %55, %cst_17 [1] : vector<16x16xf32> to vector<16xf32>
    %57 = vector.shape_cast %56 : vector<16xf32> to vector<16x1xf32>
    %58 = vector.broadcast %57 : vector<16x1xf32> to vector<16x16xf32>
    %59 = arith.subf %55, %58 : vector<16x16xf32>
    %60 = math.exp %59 : vector<16x16xf32>
    %cst_18 = arith.constant dense<0.000000e+00> : vector<16xf32>
    %61 = vector.multi_reduction <add>, %60, %cst_18 [1] : vector<16x16xf32> to vector<16xf32>
    %62 = vector.shape_cast %61 : vector<16xf32> to vector<16x1xf32>
    %63 = tpu.reciprocal %62 {approx = true} : vector<16x1xf32> -> vector<16x1xf32>
    %64 = vector.broadcast %63 : vector<16x1xf32> to vector<16x16xf32>
    %65 = arith.mulf %60, %64 : vector<16x16xf32>
    %66 = arith.truncf %65 : vector<16x16xf32> to vector<16x16xbf16>
    %67 = vector.extract_strided_slice %11 {offsets = [0, 8], sizes = [16, 8], strides = [1, 1]} : vector<16x32xbf16> to vector<16x8xbf16>
    %cst_19 = arith.constant dense<0.000000e+00> : vector<16x8xf32>
    %68 = tpu.matmul %66, %67, %cst_19 {dimension_numbers = #tpu.dot_dimension_numbers<[1], [0], [0], [1], [0, 0, 1, 1], [], []>} : vector<16x16xbf16>, vector<16x8xbf16>, vector<16x8xf32> -> vector<16x8xf32>
    %c0_20 = arith.constant 0 : index
    %c8 = arith.constant 8 : index
    %69 = vector.load %arg5[%c0_20, %c8] : memref<1x32xf32, #tpu.memory_space<vmem>>, vector<1x8xf32>
    %70 = vector.broadcast %69 : vector<1x8xf32> to vector<16x8xf32>
    %71 = arith.addf %68, %70 : vector<16x8xf32>
    %cst_21 = arith.constant 0.000000e+00 : f32
    %72 = vector.broadcast %cst_21 : f32 to vector<16x8xf32>
    %73 = arith.cmpf ogt, %71, %72 : vector<16x8xf32>
    %74 = math.exp %71 : vector<16x8xf32>
    %cst_22 = arith.constant 1.000000e+00 : f32
    %75 = vector.broadcast %cst_22 : f32 to vector<16x8xf32>
    %76 = arith.subf %74, %75 : vector<16x8xf32>
    %77 = arith.select %73, %71, %76 : vector<16x8xi1>, vector<16x8xf32>
    %78 = vector.extract_strided_slice %9 {offsets = [0, 2], sizes = [16, 1], strides = [1, 1]} : vector<16x4xf32> to vector<16x1xf32>
    %79 = vector.extract_strided_slice %13 {offsets = [2, 0], sizes = [1, 16], strides = [1, 1]} : vector<4x16xf32> to vector<1x16xf32>
    %80 = vector.broadcast %78 : vector<16x1xf32> to vector<16x16xf32>
    %81 = vector.broadcast %79 : vector<1x16xf32> to vector<16x16xf32>
    %82 = arith.addf %80, %81 : vector<16x16xf32>
    %cst_23 = arith.constant 2.000000e-01 : f32
    %83 = vector.broadcast %cst_23 : f32 to vector<16x16xf32>
    %84 = arith.mulf %83, %82 : vector<16x16xf32>
    %85 = arith.maximumf %82, %84 : vector<16x16xf32>
    %86 = arith.addf %85, %15 : vector<16x16xf32>
    %cst_24 = arith.constant dense<0xFF800000> : vector<16xf32>
    %87 = vector.multi_reduction <maximumf>, %86, %cst_24 [1] : vector<16x16xf32> to vector<16xf32>
    %88 = vector.shape_cast %87 : vector<16xf32> to vector<16x1xf32>
    %89 = vector.broadcast %88 : vector<16x1xf32> to vector<16x16xf32>
    %90 = arith.subf %86, %89 : vector<16x16xf32>
    %91 = math.exp %90 : vector<16x16xf32>
    %cst_25 = arith.constant dense<0.000000e+00> : vector<16xf32>
    %92 = vector.multi_reduction <add>, %91, %cst_25 [1] : vector<16x16xf32> to vector<16xf32>
    %93 = vector.shape_cast %92 : vector<16xf32> to vector<16x1xf32>
    %94 = tpu.reciprocal %93 {approx = true} : vector<16x1xf32> -> vector<16x1xf32>
    %95 = vector.broadcast %94 : vector<16x1xf32> to vector<16x16xf32>
    %96 = arith.mulf %91, %95 : vector<16x16xf32>
    %97 = arith.truncf %96 : vector<16x16xf32> to vector<16x16xbf16>
    %98 = vector.extract_strided_slice %11 {offsets = [0, 16], sizes = [16, 8], strides = [1, 1]} : vector<16x32xbf16> to vector<16x8xbf16>
    %cst_26 = arith.constant dense<0.000000e+00> : vector<16x8xf32>
    %99 = tpu.matmul %97, %98, %cst_26 {dimension_numbers = #tpu.dot_dimension_numbers<[1], [0], [0], [1], [0, 0, 1, 1], [], []>} : vector<16x16xbf16>, vector<16x8xbf16>, vector<16x8xf32> -> vector<16x8xf32>
    %c0_27 = arith.constant 0 : index
    %c16 = arith.constant 16 : index
    %100 = vector.load %arg5[%c0_27, %c16] : memref<1x32xf32, #tpu.memory_space<vmem>>, vector<1x8xf32>
    %101 = vector.broadcast %100 : vector<1x8xf32> to vector<16x8xf32>
    %102 = arith.addf %99, %101 : vector<16x8xf32>
    %cst_28 = arith.constant 0.000000e+00 : f32
    %103 = vector.broadcast %cst_28 : f32 to vector<16x8xf32>
    %104 = arith.cmpf ogt, %102, %103 : vector<16x8xf32>
    %105 = math.exp %102 : vector<16x8xf32>
    %cst_29 = arith.constant 1.000000e+00 : f32
    %106 = vector.broadcast %cst_29 : f32 to vector<16x8xf32>
    %107 = arith.subf %105, %106 : vector<16x8xf32>
    %108 = arith.select %104, %102, %107 : vector<16x8xi1>, vector<16x8xf32>
    %109 = vector.extract_strided_slice %9 {offsets = [0, 3], sizes = [16, 1], strides = [1, 1]} : vector<16x4xf32> to vector<16x1xf32>
    %110 = vector.extract_strided_slice %13 {offsets = [3, 0], sizes = [1, 16], strides = [1, 1]} : vector<4x16xf32> to vector<1x16xf32>
    %111 = vector.broadcast %109 : vector<16x1xf32> to vector<16x16xf32>
    %112 = vector.broadcast %110 : vector<1x16xf32> to vector<16x16xf32>
    %113 = arith.addf %111, %112 : vector<16x16xf32>
    %cst_30 = arith.constant 2.000000e-01 : f32
    %114 = vector.broadcast %cst_30 : f32 to vector<16x16xf32>
    %115 = arith.mulf %114, %113 : vector<16x16xf32>
    %116 = arith.maximumf %113, %115 : vector<16x16xf32>
    %117 = arith.addf %116, %15 : vector<16x16xf32>
    %cst_31 = arith.constant dense<0xFF800000> : vector<16xf32>
    %118 = vector.multi_reduction <maximumf>, %117, %cst_31 [1] : vector<16x16xf32> to vector<16xf32>
    %119 = vector.shape_cast %118 : vector<16xf32> to vector<16x1xf32>
    %120 = vector.broadcast %119 : vector<16x1xf32> to vector<16x16xf32>
    %121 = arith.subf %117, %120 : vector<16x16xf32>
    %122 = math.exp %121 : vector<16x16xf32>
    %cst_32 = arith.constant dense<0.000000e+00> : vector<16xf32>
    %123 = vector.multi_reduction <add>, %122, %cst_32 [1] : vector<16x16xf32> to vector<16xf32>
    %124 = vector.shape_cast %123 : vector<16xf32> to vector<16x1xf32>
    %125 = tpu.reciprocal %124 {approx = true} : vector<16x1xf32> -> vector<16x1xf32>
    %126 = vector.broadcast %125 : vector<16x1xf32> to vector<16x16xf32>
    %127 = arith.mulf %122, %126 : vector<16x16xf32>
    %128 = arith.truncf %127 : vector<16x16xf32> to vector<16x16xbf16>
    %129 = vector.extract_strided_slice %11 {offsets = [0, 24], sizes = [16, 8], strides = [1, 1]} : vector<16x32xbf16> to vector<16x8xbf16>
    %cst_33 = arith.constant dense<0.000000e+00> : vector<16x8xf32>
    %130 = tpu.matmul %128, %129, %cst_33 {dimension_numbers = #tpu.dot_dimension_numbers<[1], [0], [0], [1], [0, 0, 1, 1], [], []>} : vector<16x16xbf16>, vector<16x8xbf16>, vector<16x8xf32> -> vector<16x8xf32>
    %c0_34 = arith.constant 0 : index
    %c24 = arith.constant 24 : index
    %131 = vector.load %arg5[%c0_34, %c24] : memref<1x32xf32, #tpu.memory_space<vmem>>, vector<1x8xf32>
    %132 = vector.broadcast %131 : vector<1x8xf32> to vector<16x8xf32>
    %133 = arith.addf %130, %132 : vector<16x8xf32>
    %cst_35 = arith.constant 0.000000e+00 : f32
    %134 = vector.broadcast %cst_35 : f32 to vector<16x8xf32>
    %135 = arith.cmpf ogt, %133, %134 : vector<16x8xf32>
    %136 = math.exp %133 : vector<16x8xf32>
    %cst_36 = arith.constant 1.000000e+00 : f32
    %137 = vector.broadcast %cst_36 : f32 to vector<16x8xf32>
    %138 = arith.subf %136, %137 : vector<16x8xf32>
    %139 = arith.select %135, %133, %138 : vector<16x8xi1>, vector<16x8xf32>
    %140 = tpu.concatenate %46, %77, %108, %139 in 1 : vector<16x8xf32>, vector<16x8xf32>, vector<16x8xf32>, vector<16x8xf32> -> vector<16x32xf32>
    %c0_37 = arith.constant 0 : index
    %c0_38 = arith.constant 0 : index
    %141 = vector.load %arg7[%c0_37, %c0_38] : memref<16x32xf32, #tpu.memory_space<vmem>>, vector<16x32xf32>
    tpu.vector_store %arg7[%c0_37, %c0_38], %140 {strides = array<i32>} : memref<16x32xf32, #tpu.memory_space<vmem>>, vector<16x32xf32>,
    return
  }
  func.func @transform_0(%arg0: i32) -> (i32, i32) {
    %c0_i32 = arith.constant 0 : i32
    %c0_i32_0 = arith.constant 0 : i32
    %c0_i32_1 = arith.constant 0 : i32
    return %c0_i32, %c0_i32_0 : i32, i32
  }
  func.func @transform_1(%arg0: i32) -> (i32, i32) {
    %c0_i32 = arith.constant 0 : i32
    %c0_i32_0 = arith.constant 0 : i32
    return %arg0, %c0_i32 : i32, i32
  }
  func.func @transform_2(%arg0: i32) -> (i32, i32) {
    %c0_i32 = arith.constant 0 : i32
    %c0_i32_0 = arith.constant 0 : i32
    %c0_i32_1 = arith.constant 0 : i32
    return %c0_i32, %c0_i32_0 : i32, i32
  }
  func.func @transform_3(%arg0: i32) -> (i32, i32) {
    %c0_i32 = arith.constant 0 : i32
    %c0_i32_0 = arith.constant 0 : i32
    %c0_i32_1 = arith.constant 0 : i32
    return %c0_i32, %c0_i32_0 : i32, i32
  }
  func.func @transform_4(%arg0: i32) -> (i32, i32) {
    %c0_i32 = arith.constant 0 : i32
    %c0_i32_0 = arith.constant 0 : i32
    %c0_i32_1 = arith.constant 0 : i32
    return %c0_i32, %c0_i32_0 : i32, i32
  }
  func.func @transform_5(%arg0: i32) -> (i32, i32) {
    %c0_i32 = arith.constant 0 : i32
    %c0_i32_0 = arith.constant 0 : i32
    return %arg0, %c0_i32 : i32, i32
  }
  func.func @transform_6(%arg0: i32) -> (i32, i32) {
    %c0_i32 = arith.constant 0 : i32
    %c0_i32_0 = arith.constant 0 : i32
    return %arg0, %c0_i32 : i32, i32
  }
}

</mosaic_0001>

<bundles_post_ra>
// kernel: tpu_custom_call.1
= control target key start
LH: loop header
LB: loop body
LE: loop exit
PB: predicated region body
PF: predicated region fallthrough
CT: control target
= control target key end

     0   :  { %11 = vsyncpa [#allocation3], 0  ;;  %s1185_s0 = inlined_call_operand.hbm [shape: f32[16,1], index: 0, kind: input, shape index: {}]   ;;  %s1186_s1 = inlined_call_operand.hbm [shape: f32[16,1], index: 1, kind: input, shape index: {}]   ;;  %s1187_s2 = inlined_call_operand.hbm [shape: f32[1,36], index: 2, kind: input, shape index: {}]   ;;  %s1188_s3 = inlined_call_operand.hbm [shape: f32[1,4], index: 3, kind: input, shape index: {}]   ;;  %s1189_s4 = inlined_call_operand.hbm [shape: f32[1,32], index: 4, kind: input, shape index: {}]   ;;  %s1190_s5 = inlined_call_operand.hbm [shape: bf16[16,16], index: 5, kind: input, shape index: {}]   ;;  %s1191_s6 = inlined_call_operand.hbm [shape: f32[16,32], index: 6, kind: output, shape index: {}]  }
   0x1   :  { %12 = vsyncpa [#allocation6], 0 }
   0x2   :  { %13 = vsyncpa [#allocation9], 0 }
   0x3   :  { %14 = vsyncpa [#allocation12], 0 }
   0x4   :  { %15 = vsyncpa [#allocation4], 0  ;;  %s954_s21 = smov [#allocation5]   ;;  %s955_s23 = smov [#allocation8]  }
   0x5   :  { %s33_s22 = sshll.u32 %s954_s21, 4  ;;  %s56_s24 = sshll.u32 %s955_s23, 4  ;;  %s34_s22 = int_to_ptr.vmem [resolvable:$true] %s33_s22  ;;  %s1012_s24 = int_to_ptr.vmem [resolvable:$true] %s56_s24 }
   0x6   :  { %s790_s27 = scalar_lea.hbm %s1186_s1, 256 }
   0x7   :  { %p791_p0 = scmp.ne.s32.totalorder %s1186_s1, %s790_s27  ;;  %p794_p1 = scmp.lt.u32.totalorder %s790_s27, %s1186_s1 }
   0x9   :  { %p796_p2 = pnand %p794_p1, %p791_p0 }
   0xb   :  { %799 = shalt.err (!%p796_p2)
}
   0xc   :  { %s800_s8 = scalar_lea.vmem %s34_s22, 256  ;;  %p805_p4 = scmp.lt.s32.totalorder %s34_s22, %s34_s22 }
   0xd   :  { %p801_p3 = scmp.ne.s32.totalorder %s34_s22, %s800_s8  ;;  %p806_p5 = scmp.lt.s32.totalorder %s800_s8, %s800_s8 }
   0xf   :  { %p807_p6 = por %p806_p5, %p805_p4 }
  0x11   :  { %p808_p7 = pnand %p807_p6, %p801_p3 }
  0x13   :  { %811 = shalt.err (!%p808_p7)
}
  0x14   :  { %s956_s9 = smov 128   ;;  %s957_s10 = smov 8  }
  0x15   :  { %39 = dma.hbm_to_vmem [thread:$0]  %s1186_s1, 256, %s34_s22, [#allocation6], %s956_s9, %s956_s9, %s957_s10  }
  0x16   :  { %s812_s15 = scalar_lea.hbm %s1188_s3, 16 }
  0x17   :  { %p813_p8 = scmp.ne.s32.totalorder %s1188_s3, %s812_s15  ;;  %p816_p9 = scmp.lt.u32.totalorder %s812_s15, %s1188_s3 }
  0x19   :  { %p818_p10 = pnand %p816_p9, %p813_p8 }
  0x1b   :  { %821 = shalt.err (!%p818_p10)
}
  0x1c   :  { %s822_s20 = scalar_lea.vmem %s1012_s24, 16  ;;  %s826_s1 = scalar_lea.vmem %s1012_s24, 32 }
  0x1d   :  { %p823_p11 = scmp.ne.s32.totalorder %s1012_s24, %s822_s20  ;;  %p827_p12 = scmp.lt.s32.totalorder %s1012_s24, %s1012_s24 }
  0x1e   :  { %p828_p13 = scmp.lt.s32.totalorder %s826_s1, %s822_s20 }
  0x20   :  { %p829_p0 = por %p828_p13, %p827_p12 }
  0x22   :  { %p830_p1 = pnand %p829_p0, %p823_p11 }
  0x24   :  { %833 = shalt.err (!%p830_p1)
}
  0x25   :  { %59 = dma.hbm_to_vmem [thread:$0]  %s1188_s3, 16, %s1012_s24, [#allocation9]  }
  0x26   :  { %s958_s23 = smov [#allocation2]   ;;  %s959_s26 = smov [#allocation7]  }
  0x27   :  { %s21_s25 = sshll.u32 %s958_s23, 4  ;;  %s46_s27 = sshll.u32 %s959_s26, 4  ;;  %s22_s25 = int_to_ptr.vmem [resolvable:$true] %s21_s25  ;;  %s47_s27 = int_to_ptr.vmem [resolvable:$true] %s46_s27 }
  0x28   :  { %s834_s30 = scalar_lea.hbm %s1185_s0, 256 }
  0x29   :  { %p835_p2 = scmp.ne.s32.totalorder %s1185_s0, %s834_s30  ;;  %p838_p3 = scmp.lt.u32.totalorder %s834_s30, %s1185_s0 }
  0x2b   :  { %p840_p4 = pnand %p838_p3, %p835_p2 }
  0x2d   :  { %843 = shalt.err (!%p840_p4)
}
  0x2e   :  { %s844_s3 = scalar_lea.vmem %s22_s25, 256  ;;  %p849_p6 = scmp.lt.s32.totalorder %s22_s25, %s22_s25 }
  0x2f   :  { %p845_p5 = scmp.ne.s32.totalorder %s22_s25, %s844_s3  ;;  %p850_p7 = scmp.lt.s32.totalorder %s844_s3, %s844_s3 }
  0x31   :  { %p851_p8 = por %p850_p7, %p849_p6 }
  0x33   :  { %p852_p9 = pnand %p851_p8, %p845_p5 }
  0x35   :  { %855 = shalt.err (!%p852_p9)
}
  0x36   :  { %27 = dma.hbm_to_vmem [thread:$0]  %s1185_s0, 256, %s22_s25, [#allocation3], %s956_s9, %s956_s9, %s957_s10  }
  0x37   :  { %s856_s16 = scalar_lea.hbm %s1187_s2, 16 }
  0x38   :  { %p857_p10 = scmp.ne.s32.totalorder %s1187_s2, %s856_s16  ;;  %p860_p11 = scmp.lt.u32.totalorder %s856_s16, %s1187_s2 }
  0x3a   :  { %p862_p12 = pnand %p860_p11, %p857_p10 }
  0x3c   :  { %865 = shalt.err (!%p862_p12)
}
  0x3d   :  { %s866_s1 = scalar_lea.vmem %s47_s27, 16  ;;  %s870_s21 = scalar_lea.vmem %s47_s27, 32 }
  0x3e   :  { %p867_p13 = scmp.ne.s32.totalorder %s47_s27, %s866_s1  ;;  %p871_p0 = scmp.lt.s32.totalorder %s47_s27, %s47_s27 }
  0x3f   :  { %p872_p1 = scmp.lt.s32.totalorder %s870_s21, %s866_s1 }
  0x41   :  { %p873_p2 = por %p872_p1, %p871_p0 }
  0x43   :  { %p874_p3 = pnand %p873_p2, %p867_p13 }
  0x45   :  { %877 = shalt.err (!%p874_p3)
}
  0x46   :  { %49 = dma.hbm_to_vmem [thread:$0]  %s1187_s2, 16, %s47_s27, [#allocation6]  }
  0x47   :  { %s960_s23 = smov [#allocation10]   ;;  %s961_s26 = smov [#allocation11]  }
  0x48   :  { %s66_s25 = sshll.u32 %s960_s23, 4  ;;  %s75_s28 = sshll.u32 %s961_s26, 4  ;;  %s67_s25 = int_to_ptr.vmem [resolvable:$true] %s66_s25  ;;  %s1074_s28 = int_to_ptr.vmem [resolvable:$true] %s75_s28 }
  0x49   :  { %s878_s7 = scalar_lea.hbm %s1189_s4, 16 }
  0x4a   :  { %p879_p4 = scmp.ne.s32.totalorder %s1189_s4, %s878_s7  ;;  %p882_p5 = scmp.lt.u32.totalorder %s878_s7, %s1189_s4 }
  0x4c   :  { %p884_p6 = pnand %p882_p5, %p879_p4 }
  0x4e   :  { %887 = shalt.err (!%p884_p6)
}
  0x4f   :  { %s888_s2 = scalar_lea.vmem %s67_s25, 16  ;;  %s892_s27 = scalar_lea.vmem %s67_s25, 32 }
  0x50   :  { %p889_p7 = scmp.ne.s32.totalorder %s67_s25, %s888_s2  ;;  %p893_p8 = scmp.lt.s32.totalorder %s67_s25, %s67_s25 }
  0x51   :  { %p894_p9 = scmp.lt.s32.totalorder %s892_s27, %s888_s2 }
  0x53   :  { %p895_p10 = por %p894_p9, %p893_p8 }
  0x55   :  { %p896_p11 = pnand %p895_p10, %p889_p7 }
  0x57   :  { %899 = shalt.err (!%p896_p11)
}
  0x58   :  { %69 = dma.hbm_to_vmem [thread:$0]  %s1189_s4, 16, %s67_s25, [#allocation9]  }
  0x59   :  { %s900_s16 = scalar_lea.hbm %s1190_s5, 128 }
  0x5a   :  { %p901_p12 = scmp.ne.s32.totalorder %s1190_s5, %s900_s16  ;;  %p904_p13 = scmp.lt.u32.totalorder %s900_s16, %s1190_s5 }
  0x5c   :  { %p906_p0 = pnand %p904_p13, %p901_p12 }
  0x5e   :  { %909 = shalt.err (!%p906_p0)
}
  0x5f   :  { %s910_s1 = scalar_lea.vmem %s1074_s28, 128  ;;  %p915_p2 = scmp.lt.s32.totalorder %s1074_s28, %s1074_s28 }
  0x60   :  { %p911_p1 = scmp.ne.s32.totalorder %s1074_s28, %s910_s1  ;;  %p916_p3 = scmp.lt.s32.totalorder %s910_s1, %s910_s1 }
  0x62   :  { %p917_p4 = por %p916_p3, %p915_p2 }
  0x64   :  { %p918_p5 = pnand %p917_p4, %p911_p1 }
  0x66   :  { %921 = shalt.err (!%p918_p5)
}
  0x67   :  { %s962_s4 = smov 64   ;;  %s963_s21 = smov 4  }
  0x68   :  { %81 = dma.hbm_to_vmem [thread:$0]  %s1190_s5, 128, %s1074_s28, [#allocation12], %s962_s4, %s962_s4, %s963_s21  }
  0x69   :  { %944 = dma.done.wait [#allocation3], 256  }
  0x6a   :  { %945 = vsyncadd [#allocation3], 4294967040 }
  0x6b   :  { %946 = dma.done.wait [#allocation6], 272  }
  0x6c   :  { %947 = vsyncadd [#allocation6], 4294967024 }
  0x6d   :  { %948 = dma.done.wait [#allocation9], 32  }
  0x6e   :  { %949 = vsyncadd [#allocation9], 4294967264 }
  0x6f   :  { %950 = dma.done.wait [#allocation12], 128  }
  0x70   :  { %951 = vsyncadd [#allocation12], 4294967168  ;;  %v964_v0 = vmov 0   ;;  %v101_v1 = vld [vmem:[#allocation2] sm:$0xff]  ;;  %v103_v2 = vld [vmem:[#allocation5] sm:$0xff]  ;;  %v965_v5 = vmov 0.0   ;;  %v198_v23 = vlaneseq }
  0x71   :  { %734 = vset.pattern.permute.xlu0 %v964_v0  ;;  %735 = vset.pattern.permute.xlu1 %v964_v0  ;;  %v102_v3 = vld [vmem:[#allocation2 + $0x8] sm:$0xff]  ;;  %v104_v4 = vld [vmem:[#allocation5 + $0x8] sm:$0xff]  ;;  %v660_v6 = vld [vmem:[#allocation7] ss:$0 sm:$0xff]  ;;  %s966_s5 = smov 96   ;;  %v967_v17 = vmov 1  }
  0x72   :  { %108 = vperm.xlu0 %734, %v101_v1   ;;  %127 = vperm.xlu1 %735, %v103_v2   ;;  %v661_v8 = vld [vmem:[#allocation8] ss:$0 sm:$0xff]  ;;  %v968_v18 = vmov 2   ;;  %v969_v19 = vmov 3   ;;  %v199_v25 = vshrl.u32 %v198_v23, 7  ;;  %v676_v35 = vld [vmem:[#allocation11] sm:$0xff]  }
  0x73   :  { %687 = vmatprep.subr.bf16.mxu0 %v965_v5  ;;  %693 = vmatprep.subr.bf16.mxu1 %v965_v5  ;;  %v678_v41 = vunpack.c.h.bf16 %v676_v35  ;;  %v677_v44 = vunpack.c.l.bf16 %v676_v35  ;;  %vm210_vm0 = vcmask 130048   ;;  %s970_s23 = smov 120   ;;  %vm971_vm1 = vmmov 0   ;;  %s972_s25 = smov 104  }
  0x74   :  { %v200_v28 = vsub.s32 0, %v199_v25  ;;  %v305_v29 = vsub.s32 1, %v199_v25  ;;  %v409_v30 = vsub.s32 2, %v199_v25  ;;  %v512_v47 = vsub.s32 3, %v199_v25  ;;  %689 = vmatprep.mubr.msk.bf16.mxu0 %vm971_vm1, %v965_v5  ;;  %695 = vmatprep.mubr.msk.bf16.mxu1 %vm971_vm1, %v965_v5  ;;  %s973_s26 = smov 112   ;;  %s974_s28 = smov 16  }
  0x75   :  { %s975_s29 = smov 24   ;;  %vm629_vm8 = vcmask 64512   ;;  %vm634_vm10 = vcmask 195584   ;;  %vm637_vm12 = vcmask 261120   ;;  %s976_s30 = smov [#allocation13]  }
  0x76   :  { %113 = vperm.xlu0 %734, %v102_v3   ;;  %132 = vperm.xlu1 %735, %v104_v4   ;;  %s645_s7 = sshll.u32 %s976_s30, 4  ;;  %s646_s7 = int_to_ptr.vmem [resolvable:$true] %s645_s7 }
  0x77   :  { %s922_s8 = scalar_lea.vmem %s646_s7, 256  ;;  %p927_p7 = scmp.lt.s32.totalorder %s646_s7, %s646_s7 }
  0x78   :  { %p923_p6 = scmp.ne.s32.totalorder %s646_s7, %s922_s8  ;;  %p928_p8 = scmp.lt.s32.totalorder %s922_s8, %s922_s8 }
  0x7a   :  { %p929_p9 = por %p928_p8, %p927_p7 }
  0x7c   :  { %p930_p10 = pnand %p929_p9, %p923_p6 }
  0xf1   :  { %v109_v7 = vpop.permute.xlu0 %108  ;;  %v128_v9 = vpop.permute.xlu1 %127 }
  0xf2   :  { %v122_v10 = vmul.f32 %v660_v6, %v109_v7  ;;  %v141_v11 = vmul.f32 %v661_v8, %v128_v9 }
  0xf4   :  { %146 = vrot.lane.b32.xlu0 %v122_v10, %s966_s5 }
  0xf5   :  { %v114_v12 = vpop.permute.xlu0 %113  ;;  %v133_v13 = vpop.permute.xlu1 %132 }
  0xf6   :  { %v123_v14 = vmul.f32 %v660_v6, %v114_v12  ;;  %v142_v16 = vmul.f32 %v661_v8, %v133_v13 }
  0xf8   :  { %v1107_v15 = vpack.c.bf16 %v123_v14, %v122_v10  ;;  %190 = vperm.xlu0 %734, %v141_v11   ;;  %148 = vrot.lane.b32.xlu1 %v123_v14, %s966_s5 }
  0xfa   :  { %688 = vmatpush3.bf16.msra.mxu0 %v1107_v15 }
  0xfb   :  { %699 = vmatprep.subr.bf16.mxu0 %v965_v5 }
  0xfc   :  { %195 = vperm.xlu1 %735, %v142_v16   ;;  %736 = vset.pattern.permute.xlu0 %v967_v17 }
  0xfd   :  { %296 = vperm.xlu0 %736, %v141_v11  }
 0x100   :  { %737 = vset.pattern.permute.xlu1 %v967_v17 }
 0x101   :  { %300 = vperm.xlu1 %737, %v142_v16   ;;  %739 = vset.pattern.permute.xlu0 %v968_v18 }
 0x102   :  { %404 = vperm.xlu0 %739, %v142_v16  }
 0x105   :  { %738 = vset.pattern.permute.xlu1 %v968_v18 }
 0x106   :  { %400 = vperm.xlu1 %738, %v141_v11  }
 0x10a   :  { %740 = vset.pattern.permute.xlu1 %v969_v19 }
 0x10b   :  { %503 = vperm.xlu1 %740, %v141_v11  }
 0x10f   :  { %507 = vperm.xlu1 %740, %v142_v16  }
 0x166   :  { %v147_v20 = vpop.permute.xlu0 %146 }
 0x167   :  { %152 = vxpose.xlu0.b32.start [1/2] (short) (narrow) %v147_v20, 8 }
 0x16a   :  { %v149_v21 = vpop.permute.xlu1 %148 }
 0x16b   :  { %153 = vxpose.xlu0.b32.end [2/2] (short) (narrow) %v149_v21, 8 }
 0x177   :  { %v191_v22 = vpop.permute.xlu0 %190 }
 0x17b   :  { %v196_v26 = vpop.permute.xlu1 %195 }
 0x17c   :  { %v297_v24 = vpop.permute.xlu0 %296 }
 0x180   :  { %v301_v31 = vpop.permute.xlu1 %300 }
 0x181   :  { %v405_v27 = vpop.permute.xlu0 %404 }
 0x185   :  { %v401_v42 = vpop.permute.xlu1 %400 }
 0x18a   :  { %v504_v58 = vpop.permute.xlu1 %503 }
 0x18e   :  { %v508_v4 = vpop.permute.xlu1 %507 }
 0x194   :  { %741 = vset.pattern.permute.xlu0 %v969_v19 }
 0x1e7   :  { %v168_v32 = vpop.trf.xlu0 }
 0x1e8   :  { %v201_v33 = vrot.slane %v168_v32, %v200_v28  ;;  %v306_v34 = vrot.slane %v168_v32, %v305_v29  ;;  %v410_v36 = vrot.slane %v168_v32, %v409_v30  ;;  %v513_v55 = vrot.slane %v168_v32, %v512_v47 }
 0x1ea   :  { %v203_v37 = vadd.f32 %v201_v33, %v196_v26  ;;  %v202_v38 = vadd.f32 %v201_v33, %v191_v22  ;;  %v307_v39 = vadd.f32 %v306_v34, %v297_v24  ;;  %v308_v40 = vadd.f32 %v306_v34, %v301_v31 }
 0x1eb   :  { %v411_v48 = vadd.f32 %v410_v36, %v401_v42  ;;  %v412_v57 = vadd.f32 %v410_v36, %v405_v27  ;;  %v514_v63 = vadd.f32 %v513_v55, %v504_v58  ;;  %v515_v6 = vadd.f32 %v513_v55, %v508_v4 }
 0x1ec   :  { %v205_v43 = vmul.f32 0.2, %v203_v37  ;;  %v204_v45 = vmul.f32 0.2, %v202_v38  ;;  %v309_v46 = vmul.f32 0.2, %v307_v39 }
 0x1ed   :  { %v310_v52 = vmul.f32 0.2, %v308_v40  ;;  %v413_v56 = vmul.f32 0.2, %v411_v48  ;;  %v414_v3 = vmul.f32 0.2, %v412_v57 }
 0x1ee   :  { %v207_v49 = vmax.f32 %v203_v37, %v205_v43  ;;  %v206_v50 = vmax.f32 %v202_v38, %v204_v45  ;;  %v311_v51 = vmax.f32 %v307_v39, %v309_v46  ;;  %v516_v10 = vmul.f32 0.2, %v514_v63 }
 0x1ef   :  { %v312_v62 = vmax.f32 %v308_v40, %v310_v52  ;;  %v415_v2 = vmax.f32 %v411_v48, %v413_v56  ;;  %v416_v9 = vmax.f32 %v412_v57, %v414_v3  ;;  %v517_v14 = vmul.f32 0.2, %v515_v6 }
 0x1f0   :  { %v209_v53 = vadd.f32 %v678_v41, %v207_v49  ;;  %v208_v54 = vadd.f32 %v677_v44, %v206_v50  ;;  %v313_v61 = vadd.f32 %v677_v44, %v311_v51  ;;  %v518_v13 = vmax.f32 %v514_v63, %v516_v10  ;;  %v1142_v63 = vld [vmem:[#allocation10] ss:$0 sm:$0xff] }
 0x1f1   :  { %v314_v1 = vadd.f32 %v678_v41, %v312_v62  ;;  %v417_v8 = vadd.f32 %v677_v44, %v415_v2  ;;  %v418_v12 = vadd.f32 %v678_v41, %v416_v9  ;;  %v519_v18 = vmax.f32 %v515_v6, %v517_v14 }
 0x1f2   :  { %v214_v59 = vsel %vm210_vm0, %v209_v53, -inf  ;;  %v211_v60 = vsel %vm210_vm0, %v208_v54, -inf  ;;  %v315_v0 = vsel %vm210_vm0, %v313_v61, -inf  ;;  %v520_v17 = vadd.f32 %v677_v44, %v518_v13 }
 0x1f3   :  { %215 = vmax.xlane.f32.xlu0 %v214_v59  ;;  %212 = vmax.xlane.f32.xlu1 %v211_v60  ;;  %v318_v7 = vsel %vm210_vm0, %v314_v1, -inf  ;;  %v419_v11 = vsel %vm210_vm0, %v417_v8, -inf  ;;  %v422_v16 = vsel %vm210_vm0, %v418_v12, -inf  ;;  %v521_v20 = vadd.f32 %v678_v41, %v519_v18 }
 0x1f4   :  { %v522_v19 = vsel %vm210_vm0, %v520_v17, -inf }
 0x1f5   :  { %v525_v21 = vsel %vm210_vm0, %v521_v20, -inf }
 0x1f7   :  { %316 = vmax.xlane.f32.xlu1 %v315_v0 }
 0x1fb   :  { %319 = vmax.xlane.f32.xlu1 %v318_v7 }
 0x1ff   :  { %420 = vmax.xlane.f32.xlu1 %v419_v11 }
 0x203   :  { %423 = vmax.xlane.f32.xlu1 %v422_v16 }
 0x207   :  { %523 = vmax.xlane.f32.xlu1 %v522_v19 }
 0x20b   :  { %526 = vmax.xlane.f32.xlu1 %v525_v21 }
 0x21c   :  { %339 = vrot.lane.b32.xlu1 %v1107_v15, %s970_s23 }
 0x280   :  { %v216_v22 = vpop.xlane.xlu0 %215  ;;  %v213_v23 = vpop.xlane.xlu1 %212 }
 0x281   :  { %v218_v24 = vsub.f32 %v209_v53, %v216_v22  ;;  %v217_v25 = vsub.f32 %v208_v54, %v213_v23 }
 0x283   :  { %v219_v26 = vmul.f32 1.442695, %v217_v25  ;;  %v221_v27 = vmul.f32 1.442695, %v218_v24 }
 0x284   :  { %v317_v28 = vpop.xlane.xlu1 %316 }
 0x285   :  { %v321_v29 = vsub.f32 %v313_v61, %v317_v28  ;;  %742 = vpow2.f32 %v219_v26 }
 0x286   :  { %744 = vpow2.f32 %v221_v27 }
 0x287   :  { %v323_v30 = vmul.f32 1.442695, %v321_v29 }
 0x288   :  { %v320_v31 = vpop.xlane.xlu1 %319 }
 0x289   :  { %v322_v32 = vsub.f32 %v314_v1, %v320_v31  ;;  %746 = vpow2.f32 %v323_v30 }
 0x28b   :  { %v325_v33 = vmul.f32 1.442695, %v322_v32 }
 0x28c   :  { %v421_v34 = vpop.xlane.xlu1 %420 }
 0x28d   :  { %v425_v35 = vsub.f32 %v417_v8, %v421_v34  ;;  %748 = vpow2.f32 %v325_v33 }
 0x28f   :  { %v1121_v36 = vpop.eup %742  ;;  %v427_v37 = vmul.f32 1.442695, %v425_v35 }
 0x290   :  { %v424_v38 = vpop.xlane.xlu1 %423  ;;  %v223_v40 = vsel %vm210_vm0, %v1121_v36, 0.0  ;;  %v745_v41 = vpop.eup %744 }
 0x291   :  { %v426_v39 = vsub.f32 %v418_v12, %v424_v38  ;;  %224 = vadd.xlane.f32.xlu1 %v223_v40  ;;  %750 = vpow2.f32 %v427_v37  ;;  %v226_v45 = vsel %vm210_vm0, %v745_v41, 0.0 }
 0x293   :  { %v429_v42 = vmul.f32 1.442695, %v426_v39  ;;  %v1126_v46 = vpop.eup %746 }
 0x294   :  { %v524_v43 = vpop.xlane.xlu1 %523  ;;  %v327_v50 = vsel %vm210_vm0, %v1126_v46, 0.0 }
 0x295   :  { %752 = vpow2.f32 %v429_v42  ;;  %v528_v44 = vsub.f32 %v520_v17, %v524_v43  ;;  %227 = vadd.xlane.f32.xlu1 %v226_v45 }
 0x297   :  { %v530_v47 = vmul.f32 1.442695, %v528_v44  ;;  %v749_v51 = vpop.eup %748 }
 0x298   :  { %v527_v48 = vpop.xlane.xlu1 %526  ;;  %v330_v54 = vsel %vm210_vm0, %v749_v51, 0.0 }
 0x299   :  { %754 = vpow2.f32 %v530_v47  ;;  %v529_v49 = vsub.f32 %v521_v20, %v527_v48  ;;  %328 = vadd.xlane.f32.xlu1 %v327_v50 }
 0x29b   :  { %v532_v52 = vmul.f32 1.442695, %v529_v49  ;;  %v751_v55 = vpop.eup %750 }
 0x29c   :  { %v340_v53 = vpop.permute.xlu1 %339  ;;  %v431_v58 = vsel %vm210_vm0, %v751_v55, 0.0 }
 0x29d   :  { %756 = vpow2.f32 %v532_v52  ;;  %694 = vmatpush3.bf16.msra.mxu1 %v340_v53  ;;  %331 = vadd.xlane.f32.xlu1 %v330_v54 }
 0x29e   :  { %705 = vmatprep.subr.bf16.mxu1 %v965_v5 }
 0x29f   :  { %v753_v56 = vpop.eup %752 }
 0x2a0   :  { %v434_v57 = vsel %vm210_vm0, %v753_v56, 0.0 }
 0x2a1   :  { %435 = vadd.xlane.f32.xlu0 %v434_v57  ;;  %432 = vadd.xlane.f32.xlu1 %v431_v58 }
 0x2a3   :  { %v755_v59 = vpop.eup %754 }
 0x2a4   :  { %v534_v60 = vsel %vm210_vm0, %v755_v59, 0.0 }
 0x2a5   :  { %535 = vadd.xlane.f32.xlu1 %v534_v60 }
 0x2a7   :  { %v757_v61 = vpop.eup %756 }
 0x2a8   :  { %v537_v62 = vsel %vm210_vm0, %v757_v61, 0.0 }
 0x2a9   :  { %538 = vadd.xlane.f32.xlu0 %v537_v62 }
 0x2b6   :  { %545 = vrot.lane.b32.xlu1 %v1107_v15, %s972_s25 }
 0x2ba   :  { %342 = vrot.lane.b32.xlu1 %v1142_v63, %s970_s23 }
 0x2be   :  { %548 = vrot.lane.b32.xlu1 %v1142_v63, %s972_s25 }
 0x2bf   :  { %442 = vrot.lane.b32.xlu0 %v1107_v15, %s973_s26 }
 0x2c3   :  { %445 = vrot.lane.b32.xlu0 %v1142_v63, %s973_s26 }
 0x31e   :  { %v225_v0 = vpop.xlane.xlu1 %224 }
 0x31f   :  { %758 = vrcp.f32 %v225_v0 }
 0x322   :  { %v228_v1 = vpop.xlane.xlu1 %227 }
 0x323   :  { %760 = vrcp.f32 %v228_v1 }
 0x326   :  { %v329_v2 = vpop.xlane.xlu1 %328 }
 0x327   :  { %762 = vrcp.f32 %v329_v2 }
 0x329   :  { %v759_v4 = vpop.eup %758 }
 0x32a   :  { %v332_v3 = vpop.xlane.xlu1 %331  ;;  %v231_v8 = vmul.f32 %v759_v4, %v1121_v36 }
 0x32b   :  { %764 = vrcp.f32 %v332_v3 }
 0x32d   :  { %v761_v6 = vpop.eup %760 }
 0x32e   :  { %v436_v15 = vpop.xlane.xlu0 %435  ;;  %v433_v7 = vpop.xlane.xlu1 %432  ;;  %v232_v9 = vmul.f32 %v761_v6, %v745_v41 }
 0x32f   :  { %766 = vrcp.f32 %v436_v15 }
 0x330   :  { %768 = vrcp.f32 %v433_v7  ;;  %v233_v10 = vpack.c.bf16 %v232_v9, %v231_v8 }
 0x331   :  { %v763_v12 = vpop.eup %762 }
 0x332   :  { %690 = vmatmul.mubr.msk.bf16.vlgmr.msra.gmra.mrb[0].mxu0 %vm210_vm0, %v233_v10  ;;  %v536_v11 = vpop.xlane.xlu1 %535  ;;  %v335_v16 = vmul.f32 %v763_v12, %v1126_v46 }
 0x333   :  { %701 = vmatprep.mubr.msk.bf16.mxu0 %vm971_vm1, %v965_v5  ;;  %770 = vrcp.f32 %v536_v11 }
 0x335   :  { %v765_v13 = vpop.eup %764 }
 0x336   :  { %v539_v14 = vpop.xlane.xlu0 %538  ;;  %v336_v17 = vmul.f32 %v765_v13, %v749_v51  ;;  %v546_v24 = vpop.permute.xlu1 %545 }
 0x337   :  { %772 = vrcp.f32 %v539_v14 }
 0x338   :  { %v337_v19 = vpack.c.bf16 %v336_v17, %v335_v16 }
 0x339   :  { %v767_v18 = vpop.eup %766 }
 0x33a   :  { %v769_v20 = vpop.eup %768  ;;  %v440_v21 = vmul.f32 %v767_v18, %v753_v56  ;;  %v443_v22 = vpop.permute.xlu0 %442  ;;  %696 = vmatmul.mubr.msk.bf16.vlgmr.msra.gmra.mrb[0].mxu1 %vm210_vm0, %v337_v19 }
 0x33b   :  { %v439_v23 = vmul.f32 %v769_v20, %v751_v55  ;;  %700 = vmatpush3.bf16.msra.mxu0 %v443_v22  ;;  %706 = vmatpush3.bf16.msra.mxu1 %v546_v24  ;;  %v343_v35 = vpop.permute.xlu1 %342 }
 0x33c   :  { %707 = vmatprep.mubr.msk.bf16.mxu1 %vm971_vm1, %v965_v5 }
 0x33d   :  { %v441_v25 = vpack.c.bf16 %v440_v21, %v439_v23  ;;  %v771_v26 = vpop.eup %770 }
 0x33e   :  { %v542_v28 = vmul.f32 %v771_v26, %v755_v59  ;;  %v446_v39 = vpop.permute.xlu0 %445 }
 0x33f   :  { %702 = vmatmul.mubr.msk.bf16.vlgmr.msra.gmra.mrb[4].mxu0 %vm210_vm0, %v441_v25  ;;  %v549_v52 = vpop.permute.xlu1 %548 }
 0x341   :  { %v773_v27 = vpop.eup %772 }
 0x342   :  { %v543_v29 = vmul.f32 %v773_v27, %v757_v61 }
 0x344   :  { %v544_v30 = vpack.c.bf16 %v543_v29, %v542_v28 }
 0x346   :  { %708 = vmatmul.mubr.msk.bf16.vlgmr.msra.gmra.mrb[4].mxu1 %vm210_vm0, %v544_v30 }
 0x405   :  { %v1158_v31 = vpop.f32.mrb[0].mxu0 }
 0x406   :  { %v691_v32 = vpop.f32.mrb[1].mxu0  ;;  %v279_v17 = vadd.f32 %v1142_v63, %v1158_v31 }
 0x407   :  { %v1160_v33 = vpop.f32.mrb[2].mxu0 }
 0x408   :  { %v692_v34 = vpop.f32.mrb[3].mxu0  ;;  %v282_v18 = vadd.f32 %v1142_v63, %v1160_v33  ;;  %v287_v19 = vmul.f32 1.442695, %v279_v17  ;;  %vm285_vm9 = vcmp.gt.f32.partialorder %v279_v17, 0.0 }
 0x40a   :  { %v289_v20 = vmul.f32 1.442695, %v282_v18  ;;  %vm286_vm11 = vcmp.gt.f32.partialorder %v282_v18, 0.0 }
 0x40d   :  { %v382_v36 = vpop.f32.mrb[0].mxu1 }
 0x40e   :  { %v383_v37 = vadd.f32 %v382_v36, %v343_v35  ;;  %v697_v5 = vpop.f32.mrb[1].mxu1 }
 0x40f   :  { %v385_v38 = vpop.f32.mrb[2].mxu1 }
 0x410   :  { %v391_v40 = vmul.f32 1.442695, %v383_v37  ;;  %v386_v41 = vadd.f32 %v385_v38, %v343_v35  ;;  %v698_v42 = vpop.f32.mrb[3].mxu1  ;;  %vm389_vm2 = vcmp.gt.f32.partialorder %v383_v37, 0.0 }
 0x412   :  { %v485_v43 = vpop.f32.mrb[4].mxu0  ;;  %774 = vpow2.f32 %v391_v40  ;;  %v393_v44 = vmul.f32 1.442695, %v386_v41  ;;  %vm390_vm3 = vcmp.gt.f32.partialorder %v386_v41, 0.0 }
 0x413   :  { %v486_v45 = vadd.f32 %v485_v43, %v446_v39  ;;  %v703_v46 = vpop.f32.mrb[5].mxu0 }
 0x414   :  { %v488_v47 = vpop.f32.mrb[6].mxu0  ;;  %776 = vpow2.f32 %v393_v44 }
 0x415   :  { %v494_v48 = vmul.f32 1.442695, %v486_v45  ;;  %v489_v49 = vadd.f32 %v488_v47, %v446_v39  ;;  %v704_v50 = vpop.f32.mrb[7].mxu0  ;;  %vm492_vm4 = vcmp.gt.f32.partialorder %v486_v45, 0.0 }
 0x417   :  { %778 = vpow2.f32 %v494_v48  ;;  %v496_v51 = vmul.f32 1.442695, %v489_v49  ;;  %vm493_vm5 = vcmp.gt.f32.partialorder %v489_v49, 0.0 }
 0x419   :  { %780 = vpow2.f32 %v496_v51  ;;  %v588_v53 = vpop.f32.mrb[4].mxu1 }
 0x41a   :  { %v589_v54 = vadd.f32 %v588_v53, %v549_v52  ;;  %v709_v55 = vpop.f32.mrb[5].mxu1 }
 0x41b   :  { %v591_v56 = vpop.f32.mrb[6].mxu1 }
 0x41c   :  { %v597_v57 = vmul.f32 1.442695, %v589_v54  ;;  %v592_v58 = vadd.f32 %v591_v56, %v549_v52  ;;  %v710_v59 = vpop.f32.mrb[7].mxu1  ;;  %v775_v60 = vpop.eup %774  ;;  %vm595_vm6 = vcmp.gt.f32.partialorder %v589_v54, 0.0 }
 0x41d   :  { %v667_v62 = vadd.f32 -1.0, %v775_v60 }
 0x41e   :  { %782 = vpow2.f32 %v597_v57  ;;  %v599_v61 = vmul.f32 1.442695, %v592_v58  ;;  %v777_v0 = vpop.eup %776  ;;  %vm596_vm7 = vcmp.gt.f32.partialorder %v592_v58, 0.0 }
 0x41f   :  { %v397_v1 = vsel %vm389_vm2, %v383_v37, %v667_v62  ;;  %v668_v2 = vadd.f32 -1.0, %v777_v0 }
 0x420   :  { %784 = vpow2.f32 %v599_v61  ;;  %607 = vrot.lane.b32.xlu0 %v397_v1, %s957_s10 }
 0x421   :  { %v779_v3 = vpop.eup %778  ;;  %v398_v4 = vsel %vm390_vm3, %v386_v41, %v668_v2  ;;  %786 = vpow2.f32 %v287_v19 }
 0x422   :  { %v670_v6 = vadd.f32 -1.0, %v779_v3  ;;  %609 = vrot.lane.b32.xlu1 %v398_v4, %s957_s10  ;;  %788 = vpow2.f32 %v289_v20 }
 0x423   :  { %v781_v15 = vpop.eup %780 }
 0x424   :  { %v500_v7 = vsel %vm492_vm4, %v486_v45, %v670_v6  ;;  %v671_v8 = vadd.f32 -1.0, %v781_v15 }
 0x425   :  { %615 = vrot.lane.b32.xlu0 %v500_v7, %s974_s28 }
 0x426   :  { %v501_v9 = vsel %vm493_vm5, %v489_v49, %v671_v8 }
 0x427   :  { %617 = vrot.lane.b32.xlu1 %v501_v9, %s974_s28 }
 0x428   :  { %v783_v10 = vpop.eup %782 }
 0x429   :  { %v673_v11 = vadd.f32 -1.0, %v783_v10 }
 0x42a   :  { %v785_v12 = vpop.eup %784 }
 0x42b   :  { %v603_v13 = vsel %vm595_vm6, %v589_v54, %v673_v11  ;;  %v674_v14 = vadd.f32 -1.0, %v785_v12  ;;  %v787_v22 = vpop.eup %786 }
 0x42c   :  { %623 = vrot.lane.b32.xlu0 %v603_v13, %s975_s29  ;;  %v789_v24 = vpop.eup %788  ;;  %v664_v25 = vadd.f32 -1.0, %v787_v22 }
 0x42d   :  { %v604_v16 = vsel %vm596_vm7, %v592_v58, %v674_v14  ;;  %v665_v26 = vadd.f32 -1.0, %v789_v24 }
 0x42e   :  { %625 = vrot.lane.b32.xlu1 %v604_v16, %s975_s29  ;;  %v293_v28 = vsel %vm285_vm9, %v279_v17, %v664_v25 }
 0x42f   :  { %v294_v63 = vsel %vm286_vm11, %v282_v18, %v665_v26 }
 0x492   :  { %v608_v21 = vpop.permute.xlu0 %607 }
 0x493   :  { %v630_v30 = vsel %vm629_vm8, %v293_v28, %v608_v21 }
 0x494   :  { %v610_v23 = vpop.permute.xlu1 %609 }
 0x495   :  { %v631_v33 = vsel %vm629_vm8, %v294_v63, %v610_v23 }
 0x497   :  { %v616_v27 = vpop.permute.xlu0 %615 }
 0x498   :  { %v632_v31 = vsel %vm210_vm0, %v630_v30, %v616_v27 }
 0x499   :  { %v618_v29 = vpop.permute.xlu1 %617 }
 0x49a   :  { %v633_v35 = vsel %vm210_vm0, %v631_v33, %v618_v29 }
 0x49e   :  { %v624_v32 = vpop.permute.xlu0 %623 }
 0x49f   :  { %v635_v34 = vsel %vm634_vm10, %v632_v31, %v624_v32 }
 0x4a0   :  { %v626_v36 = vpop.permute.xlu1 %625  ;;  %638 = vst.msk [vmem:[#allocation13] sm:$0xff] %vm637_vm12, %v635_v34 }
 0x4a1   :  { %v636_v37 = vsel %vm634_vm10, %v633_v35, %v626_v36 }
 0x4a2   :  { %639 = vst.msk [vmem:[#allocation13 + $0x8] sm:$0xff] %vm637_vm12, %v636_v37 }
 0x4a3   :  { %933 = shalt.err (!%p930_p10)
}
 0x4a4   :  { %s934_s3 = scalar_lea.hbm %s1191_s6, 256 }
 0x4a5   :  { %p935_p11 = scmp.ne.s32.totalorder %s1191_s6, %s934_s3  ;;  %p938_p12 = scmp.lt.u32.totalorder %s934_s3, %s1191_s6 }
 0x4a7   :  { %p940_p13 = pnand %p938_p12, %p935_p11 }
 0x4a9   :  { %943 = shalt.err (!%p940_p13)
}
 0x4aa   :  { %651 = dma.vmem_to_hbm [thread:$0]  %s646_s7, 256, %s1191_s6, [#allocation4], %s956_s9, %s956_s9, %s957_s10  }
 0x4ab   :  { %952 = dma.done.wait [#allocation4], 256  }
 0x4ac   :  { %953 = vsyncadd [#allocation4], 4294967040 }
 0x4ad   :  { %655 = vsyncpa [#allocation3], 1 }
 0x4ae   :  { %656 = vsyncpa [#allocation6], 1 }
 0x4af   :  { %657 = vsyncpa [#allocation9], 1 }
 0x4b0   :  { %658 = vsyncpa [#allocation12], 1 }
 0x4b1   :  { %659 = vsyncpa [#allocation4], 1 }

</bundles_post_ra>
